<compile_context>
chip_gen: v7x
topology: tpu7x:2x2x1
jax: 0.10.0
libtpu: 0.0.40
codegen_flags: <defaults>
</compile_context>

<pallas_src>
import functools

import jax
import jax.numpy as jnp
from jax.experimental import pallas as pl
from jax.experimental.pallas import tpu as pltpu


def _phi_head_kernel(xo_ref, xc_ref, w1p_ref, w1e_ref, b1_ref, w2_ref, b2_ref, o_ref):
    # xo_ref : (1, Dp, T)   offset-embed tile (channels x pixels, pixels on lanes)
    # xc_ref : (1, De, T)   cond-embed tile
    # w1p_ref: (Hd, Dp)     fc1 weight, offset part      b1_ref: (Hd, 1)
    # w1e_ref: (Hd, De)     fc1 weight, cond part
    # w2_ref : (1, Hd)      fc2 weight                   b2_ref: (1, 1) scalar in SMEM
    # o_ref  : (1, 1, T)    lane-dense logit tile
    xo = xo_ref[0]                                       # (Dp, T)
    xc = xc_ref[0]                                       # (De, T)
    # fc1 on the split weights == fc1 on the channel-concatenated input.
    h = jnp.dot(w1p_ref[...], xo, preferred_element_type=jnp.float32)
    h = h + jnp.dot(w1e_ref[...], xc, preferred_element_type=jnp.float32)
    h = h + b1_ref[...]                                  # (Hd, 1) lane-broadcast bias
    h = jnp.maximum(h, 0.0)                              # ReLU (f32, VPU)
    o = jnp.dot(w2_ref[...], h, preferred_element_type=jnp.float32)   # (1, T)
    o = o + b2_ref[0, 0]                                 # SMEM scalar bias
    o_ref[...] = o.reshape(o_ref.shape).astype(o_ref.dtype)


@functools.partial(jax.jit, static_argnames=("tp",))
def phi_head_forward(offset_embed, cond_embed, w1, b1, w2, b2, *, tp=2048):
    """offset_embed: (N, Dp, H, W), cond_embed: (N, De, H, W)  -> (N, 1, H, W).

    w1: (hidden, Dp+De), b1: (hidden,), w2: (1, hidden), b2: (1,)  (PyTorch conv layout).
    """
    n, dp, hh, ww = offset_embed.shape
    de = cond_embed.shape[1]
    hidden = w1.shape[0]
    p = hh * ww

    # Channels-first with pixels flattened on the last (lane) axis.  These reshapes are
    # contiguous views of NCHW -> no extra HBM pass (no concat, no NHWC transpose).
    xo = offset_embed.reshape(n, dp, p)
    xc = cond_embed.reshape(n, de, p)

    # Lane-dense pixel tile: multiple of 128, capped at `tp` (default 2048 pixels ->
    # x tiles ~64 KiB, h intermediate ~512 KiB; fits v5e 16 MiB scoped VMEM with
    # double buffering and well under the v7x 32 MiB default).
    p128 = pl.cdiv(p, 128) * 128
    t = min(tp, p128)
    p_pad = pl.cdiv(p, t) * t
    if p_pad != p:
        xo = jnp.pad(xo, ((0, 0), (0, 0), (0, p_pad - p)))
        xc = jnp.pad(xc, ((0, 0), (0, 0), (0, p_pad - p)))

    # Split fc1 weight so the channel concat never materializes in HBM.
    w1p = w1[:, :dp]                      # (hidden, Dp)
    w1e = w1[:, dp:]                      # (hidden, De)
    b1c = b1.reshape(hidden, 1)           # column bias, broadcasts over lanes
    w2r = w2.reshape(1, hidden)
    b2s = b2.reshape(1, 1)                # scalar -> SMEM

    grid = (n, p_pad // t)                # both axes independent -> megacore-parallel

    out = pl.pallas_call(
        _phi_head_kernel,
        out_shape=jax.ShapeDtypeStruct((n, 1, p_pad), offset_embed.dtype),
        grid_spec=pltpu.PrefetchScalarGridSpec(
            num_scalar_prefetch=0,
            grid=grid,
            in_specs=[
                pl.BlockSpec((1, dp, t), lambda i, j: (i, 0, j)),        # offset tile
                pl.BlockSpec((1, de, t), lambda i, j: (i, 0, j)),        # cond tile
                pl.BlockSpec((hidden, dp), lambda i, j: (0, 0)),         # fc1 W (offset)
                pl.BlockSpec((hidden, de), lambda i, j: (0, 0)),         # fc1 W (cond)
                pl.BlockSpec((hidden, 1), lambda i, j: (0, 0)),          # fc1 bias
                pl.BlockSpec((1, hidden), lambda i, j: (0, 0)),          # fc2 W
                pl.BlockSpec(memory_space=pltpu.MemorySpace.SMEM),       # fc2 bias scalar
            ],
            out_specs=pl.BlockSpec((1, 1, t), lambda i, j: (i, 0, j)),   # lane-dense out
        ),
        compiler_params=pltpu.CompilerParams(
            dimension_semantics=("parallel", "parallel"),
        ),
    )(xo, xc, w1p, w1e, b1c, w2r, b2s)

    out = out[:, :, :p].reshape(n, 1, hh, ww)   # drop pixel padding; already NCHW
    return out


def init_phi_head_params(key, dp, de, hidden_ch=64, dtype=jnp.float32):
    """Deterministic init mimicking nn.Conv2d default (uniform +- 1/sqrt(fan_in)).

    Returned in PyTorch conv orientation: w = (out_ch, in_ch), b = (out_ch,)."""
    cin = dp + de
    k1, k2, k3, k4 = jax.random.split(key, 4)
    lim1 = 1.0 / jnp.sqrt(cin)
    lim2 = 1.0 / jnp.sqrt(hidden_ch)
    w1 = jax.random.uniform(k1, (hidden_ch, cin), dtype, -lim1, lim1)
    b1 = jax.random.uniform(k2, (hidden_ch,), dtype, -lim1, lim1)
    w2 = jax.random.uniform(k3, (1, hidden_ch), dtype, -lim2, lim2)
    b2 = jax.random.uniform(k4, (1,), dtype, -lim2, lim2)
    return w1, b1, w2, b2


if __name__ == "__main__":
    key = jax.random.PRNGKey(0)
    k_off, k_cond, k_param = jax.random.split(key, 3)

    # Small shapes consistent with the module: N=2, Dp=4, De=4, H=W=16, hidden=64.
    N, Dp, De, H, W = 2, 4, 4, 16, 16
    hidden_ch = 64

    offset_embed = jax.random.normal(k_off, (N, Dp, H, W), jnp.float32)
    cond_embed = jax.random.normal(k_cond, (N, De, H, W), jnp.float32)
    w1, b1, w2, b2 = init_phi_head_params(k_param, Dp, De, hidden_ch)

    out = phi_head_forward(offset_embed, cond_embed, w1, b1, w2, b2)
    out = jax.block_until_ready(out)
    assert out.shape == (N, 1, H, W), out.shape

    # Pure-JAX reference of the 1x1-conv MLP (channels-first semantics).
    x_ref = jnp.concatenate([offset_embed, cond_embed], axis=1)          # (N, Cin, H, W)
    h_ref = jnp.einsum("oc,nchw->nohw", w1, x_ref) + b1.reshape(1, -1, 1, 1)
    h_ref = jnp.maximum(h_ref, 0.0)
    ref = jnp.einsum("oc,nchw->nohw", w2, h_ref) + b2.reshape(1, 1, 1, 1)
    assert jnp.allclose(out, ref, atol=1e-5, rtol=1e-5)

    print("KERNEL_OK")
</pallas_src>

<mosaic_0001>
module attributes {stable_mosaic.version = 11 : i64} {
  func.func @_phi_head_kernel(%arg0: i32, %arg1: i32, %arg2: memref<1x4x256xf32, #tpu.memory_space<vmem>>, %arg3: memref<1x4x256xf32, #tpu.memory_space<vmem>>, %arg4: memref<64x4xf32, #tpu.memory_space<vmem>>, %arg5: memref<64x4xf32, #tpu.memory_space<vmem>>, %arg6: memref<64x1xf32, #tpu.memory_space<vmem>>, %arg7: memref<1x64xf32, #tpu.memory_space<vmem>>, %arg8: memref<1x1xf32, #tpu.memory_space<smem>>, %arg9: memref<1x1x256xf32, #tpu.memory_space<vmem>>) attributes {dimension_semantics = [#tpu.dimension_semantics<parallel>, #tpu.dimension_semantics<parallel>], iteration_bounds = array<i64: 2, 1>, scalar_prefetch = 0 : i64, scratch_operands = 0 : i64, tpu.core_type = #tpu.core_type<tc>, window_params = [{transform_indices = @transform_0, window_bounds = array<i64: 1, 4, 256>}, {transform_indices = @transform_1, window_bounds = array<i64: 1, 4, 256>}, {pipeline_mode = #tpu.pipeline_mode<synchronous>, transform_indices = @transform_2, window_bounds = array<i64: 64, 4>}, {pipeline_mode = #tpu.pipeline_mode<synchronous>, transform_indices = @transform_3, window_bounds = array<i64: 64, 4>}, {pipeline_mode = #tpu.pipeline_mode<synchronous>, transform_indices = @transform_4, window_bounds = array<i64: 64, 1>}, {pipeline_mode = #tpu.pipeline_mode<synchronous>, transform_indices = @transform_5, window_bounds = array<i64: 1, 64>}, {transform_indices = @transform_6, window_bounds = array<i64: 1, 1>}, {transform_indices = @transform_7, window_bounds = array<i64: 1, 1, 256>}]} {
    %c0 = arith.constant 0 : index
    %c0_0 = arith.constant 0 : index
    %c0_1 = arith.constant 0 : index
    %0 = vector.load %arg2[%c0, %c0_0, %c0_1] : memref<1x4x256xf32, #tpu.memory_space<vmem>>, vector<1x4x256xf32>
    %1 = vector.shape_cast %0 : vector<1x4x256xf32> to vector<4x256xf32>
    %c0_2 = arith.constant 0 : index
    %c0_3 = arith.constant 0 : index
    %c0_4 = arith.constant 0 : index
    %2 = vector.load %arg3[%c0_2, %c0_3, %c0_4] : memref<1x4x256xf32, #tpu.memory_space<vmem>>, vector<1x4x256xf32>
    %3 = vector.shape_cast %2 : vector<1x4x256xf32> to vector<4x256xf32>
    %c0_5 = arith.constant 0 : index
    %c0_6 = arith.constant 0 : index
    %4 = vector.load %arg4[%c0_5, %c0_6] : memref<64x4xf32, #tpu.memory_space<vmem>>, vector<64x4xf32>
    %cst = arith.constant dense<0.000000e+00> : vector<64x256xf32>
    %5 = tpu.matmul %4, %1, %cst {dimension_numbers = #tpu.dot_dimension_numbers<[1], [0], [0], [1], [0, 0, 1, 1], [], []>} : vector<64x4xf32>, vector<4x256xf32>, vector<64x256xf32> -> vector<64x256xf32>
    %c0_7 = arith.constant 0 : index
    %c0_8 = arith.constant 0 : index
    %6 = vector.load %arg5[%c0_7, %c0_8] : memref<64x4xf32, #tpu.memory_space<vmem>>, vector<64x4xf32>
    %cst_9 = arith.constant dense<0.000000e+00> : vector<64x256xf32>
    %7 = tpu.matmul %6, %3, %cst_9 {dimension_numbers = #tpu.dot_dimension_numbers<[1], [0], [0], [1], [0, 0, 1, 1], [], []>} : vector<64x4xf32>, vector<4x256xf32>, vector<64x256xf32> -> vector<64x256xf32>
    %8 = arith.addf %5, %7 : vector<64x256xf32>
    %c0_10 = arith.constant 0 : index
    %c0_11 = arith.constant 0 : index
    %9 = vector.load %arg6[%c0_10, %c0_11] : memref<64x1xf32, #tpu.memory_space<vmem>>, vector<64x1xf32>
    %10 = vector.broadcast %9 : vector<64x1xf32> to vector<64x256xf32>
    %11 = arith.addf %8, %10 : vector<64x256xf32>
    %cst_12 = arith.constant 0.000000e+00 : f32
    %12 = vector.broadcast %cst_12 : f32 to vector<64x256xf32>
    %13 = arith.maximumf %11, %12 : vector<64x256xf32>
    %c0_13 = arith.constant 0 : index
    %c0_14 = arith.constant 0 : index
    %14 = vector.load %arg7[%c0_13, %c0_14] : memref<1x64xf32, #tpu.memory_space<vmem>>, vector<1x64xf32>
    %cst_15 = arith.constant dense<0.000000e+00> : vector<1x256xf32>
    %15 = tpu.matmul %14, %13, %cst_15 {dimension_numbers = #tpu.dot_dimension_numbers<[1], [0], [0], [1], [0, 0, 1, 1], [], []>} : vector<1x64xf32>, vector<64x256xf32>, vector<1x256xf32> -> vector<1x256xf32>
    %c0_16 = arith.constant 0 : index
    %c0_17 = arith.constant 0 : index
    %16 = memref.load %arg8[%c0_16, %c0_17] : memref<1x1xf32, #tpu.memory_space<smem>>
    %17 = vector.broadcast %16 : f32 to vector<1x256xf32>
    %18 = arith.addf %15, %17 : vector<1x256xf32>
    %19 = vector.shape_cast %18 : vector<1x256xf32> to vector<1x1x256xf32>
    %c0_18 = arith.constant 0 : index
    %c0_19 = arith.constant 0 : index
    %c0_20 = arith.constant 0 : index
    %20 = vector.load %arg9[%c0_18, %c0_19, %c0_20] : memref<1x1x256xf32, #tpu.memory_space<vmem>>, vector<1x1x256xf32>
    tpu.vector_store %arg9[%c0_18, %c0_19, %c0_20], %19 {strides = array<i32>} : memref<1x1x256xf32, #tpu.memory_space<vmem>>, vector<1x1x256xf32>,
    return
  }
  func.func @transform_0(%arg0: i32, %arg1: i32) -> (i32, i32, i32) {
    %c0_i32 = arith.constant 0 : i32
    %c0_i32_0 = arith.constant 0 : i32
    return %arg0, %c0_i32, %arg1 : i32, i32, i32
  }
  func.func @transform_1(%arg0: i32, %arg1: i32) -> (i32, i32, i32) {
    %c0_i32 = arith.constant 0 : i32
    %c0_i32_0 = arith.constant 0 : i32
    return %arg0, %c0_i32, %arg1 : i32, i32, i32
  }
  func.func @transform_2(%arg0: i32, %arg1: i32) -> (i32, i32) {
    %c0_i32 = arith.constant 0 : i32
    %c0_i32_0 = arith.constant 0 : i32
    %c0_i32_1 = arith.constant 0 : i32
    return %c0_i32, %c0_i32_0 : i32, i32
  }
  func.func @transform_3(%arg0: i32, %arg1: i32) -> (i32, i32) {
    %c0_i32 = arith.constant 0 : i32
    %c0_i32_0 = arith.constant 0 : i32
    %c0_i32_1 = arith.constant 0 : i32
    return %c0_i32, %c0_i32_0 : i32, i32
  }
  func.func @transform_4(%arg0: i32, %arg1: i32) -> (i32, i32) {
    %c0_i32 = arith.constant 0 : i32
    %c0_i32_0 = arith.constant 0 : i32
    %c0_i32_1 = arith.constant 0 : i32
    return %c0_i32, %c0_i32_0 : i32, i32
  }
  func.func @transform_5(%arg0: i32, %arg1: i32) -> (i32, i32) {
    %c0_i32 = arith.constant 0 : i32
    %c0_i32_0 = arith.constant 0 : i32
    %c0_i32_1 = arith.constant 0 : i32
    return %c0_i32, %c0_i32_0 : i32, i32
  }
  func.func @transform_6(%arg0: i32, %arg1: i32) -> (i32, i32) {
    %c0_i32 = arith.constant 0 : i32
    %c0_i32_0 = arith.constant 0 : i32
    %c0_i32_1 = arith.constant 0 : i32
    return %c0_i32, %c0_i32_0 : i32, i32
  }
  func.func @transform_7(%arg0: i32, %arg1: i32) -> (i32, i32, i32) {
    %c0_i32 = arith.constant 0 : i32
    %c0_i32_0 = arith.constant 0 : i32
    return %arg0, %c0_i32, %arg1 : i32, i32, i32
  }
}

</mosaic_0001>

<bundles_post_ra>
// kernel: phi_head_forward.1
= control target key start
LH: loop header
LB: loop body
LE: loop exit
PB: predicated region body
PF: predicated region fallthrough
CT: control target
= control target key end

     0   :  { %s1107_s26 = smov 0   ;;  %s1109_s27 = smov 0   ;;  %s1255_s0 = inlined_call_operand.vmem [shape: f32[2,4,256], index: 0, kind: input, shape index: {}]   ;;  %s1256_s1 = inlined_call_operand.vmem [shape: f32[2,4,256], index: 1, kind: input, shape index: {}]   ;;  %s1257_s2 = inlined_call_operand.vmem [shape: f32[64,4], index: 2, kind: input, shape index: {}]   ;;  %s1258_s3 = inlined_call_operand.vmem [shape: f32[64,4], index: 3, kind: input, shape index: {}]   ;;  %s1259_s4 = inlined_call_operand.vmem [shape: f32[64,1], index: 4, kind: input, shape index: {}]   ;;  %s1260_s5 = inlined_call_operand.vmem [shape: f32[1,64], index: 5, kind: input, shape index: {}]   ;;  %s1261_s6 = inlined_call_operand.<no memory space> [shape: f32[1,1], index: 6, kind: input, shape index: {}]   ;;  %s1262_s7 = inlined_call_operand.vmem [shape: f32[2,1,256], index: 7, kind: output, shape index: {}]  }
   0x1   :  { %12 = sst [smem:[#allocation2]] %s1261_s6  ;;  %s1111_s28 = smov 0  }
   0x2 LB: > { %s30_s6 = sadd.s32 1, %s1055_s27  ;;  %p943_p0 = scmp.ge.s32.totalorder %s1059_s28, 1  ;;  %s1059_s28 = sphi %s1111_s28, %s18_s28   ;;  %s1055_s27 = sphi %s1109_s27, %s1264_s27   ;;  %s1051_s26 = sphi %s1107_s26, %s1263_s26  }
   0x3   : > { %p32_p1 = scmp.ge.s32.totalorder %s30_s6, 2  ;;  %p276_p2 = scmp.lt.s32.totalorder %s1059_s28, 3 }
   0x5   : > { %s1266_s6 = smov (%p32_p1, %s30_s6), 0  ;;  %p277_p3 = pnand %p943_p0, %p276_p2 }
   0x6   : > { %p325_p4 = scmp.lt.s32.totalorder (!%p277_p3), %s1051_s26, 1  ;;  %v1061_v0 = vmov (!%p277_p3), 0.0   ;;  %v1062_v1 = vmov (!%p277_p3), 0   ;;  %v659_v2 = vld [vmem:[%s1259_s4] sm:$0xff] (!%p277_p3)  ;;  %vm398_vm0 = vcmask (!%p277_p3), 1043456   ;;  %v661_v4 = vld [vmem:[%s1259_s4 + $0x10] sm:$0xff] (!%p277_p3) }
   0x7   : > { %280 = sbr.rel (%p277_p3) target bundleno = 498 (0x1f2), region = 48  ;;  %467 = vmatprep.mubr.f32.mxu1 (!%p277_p3), %v1061_v0  ;;  %610 = vmatprep.mubr.f32.mxu0 (!%p277_p3), %v1061_v0  ;;  %v363_v8 = vld [vmem:[%s1258_s3] sm:$0xff] (!%p277_p3)  ;;  %vm373_vm1 = vcmask (!%p277_p3), 31744   ;;  %v660_v10 = vld [vmem:[%s1259_s4 + $0x8] sm:$0xff] (!%p277_p3)  ;;  %v662_v11 = vld [vmem:[%s1259_s4 + $0x18] sm:$0xff] (!%p277_p3)  ;;  %vm742_vm2 = vcmask (!%p277_p3), 523264  }
   0x8   : > { %1033 = vset.pattern.permute.xlu0 (!%p277_p3), %v1062_v1  ;;  %1034 = vset.pattern.permute.xlu1 (!%p277_p3), %v1062_v1  ;;  %v355_v9 = vld [vmem:[%s1257_s2] sm:$0xff] (!%p277_p3)  ;;  %v364_v12 = vld [vmem:[%s1258_s3 + $0x8] sm:$0xff] (!%p277_p3)  ;;  %v365_v16 = vld [vmem:[%s1258_s3 + $0x10] sm:$0xff] (!%p277_p3)  ;;  %s740_s23 = sld [smem:[#allocation2]] (!%p277_p3) }
   0x9   : > { %669 = vperm.xlu0 (!%p277_p3), %1033, %v659_v2   ;;  %679 = vperm.xlu1 (!%p277_p3), %1034, %v661_v4   ;;  %v356_v13 = vld [vmem:[%s1257_s2 + $0x8] sm:$0xff] (!%p277_p3)  ;;  %v663_v14 = vld [vmem:[%s1259_s4 + $0x20] sm:$0xff] (!%p277_p3)  ;;  %v357_v17 = vld [vmem:[%s1257_s2 + $0x10] sm:$0xff] (!%p277_p3) }
   0xa   : > { %v664_v15 = vld [vmem:[%s1259_s4 + $0x28] sm:$0xff] (!%p277_p3)  ;;  %v665_v18 = vld [vmem:[%s1259_s4 + $0x30] sm:$0xff] (!%p277_p3)  ;;  %v666_v19 = vld [vmem:[%s1259_s4 + $0x38] sm:$0xff] (!%p277_p3) }
   0xb   : > { %v366_v20 = vld [vmem:[%s1258_s3 + $0x18] sm:$0xff] (!%p277_p3)  ;;  %v367_v22 = vld [vmem:[%s1258_s3 + $0x20] sm:$0xff] (!%p277_p3)  ;;  %v368_v24 = vld [vmem:[%s1258_s3 + $0x28] sm:$0xff] (!%p277_p3) }
   0xc   : > { %v358_v21 = vld [vmem:[%s1257_s2 + $0x18] sm:$0xff] (!%p277_p3)  ;;  %v359_v23 = vld [vmem:[%s1257_s2 + $0x20] sm:$0xff] (!%p277_p3)  ;;  %v360_v25 = vld [vmem:[%s1257_s2 + $0x28] sm:$0xff] (!%p277_p3) }
   0xd   : > { %674 = vperm.xlu0 (!%p277_p3), %1033, %v660_v10   ;;  %684 = vperm.xlu1 (!%p277_p3), %1034, %v662_v11   ;;  %v369_v26 = vld [vmem:[%s1258_s3 + $0x30] sm:$0xff] (!%p277_p3)  ;;  %v370_v28 = vld [vmem:[%s1258_s3 + $0x38] sm:$0xff] (!%p277_p3) }
   0xe   : > { %s1268_s26 = smov (!%p325_p4, %s1051_s26), 1  ;;  %v361_v27 = vld [vmem:[%s1257_s2 + $0x30] sm:$0xff]  ;;  %v362_v29 = vld [vmem:[%s1257_s2 + $0x38] sm:$0xff] }
   0xf   : > { %s972_s29 = sshll.u32 %s1268_s26, 3  ;;  %s948_s24 = sshll.u32 %s1268_s26, 1 }
  0x10   : > { %s342_s9 = scalar_lea.vmem %s1256_s1, %s972_s29  ;;  %s332_s14 = scalar_lea.vmem %s1255_s0, %s972_s29 }
  0x11   : > { %v354_v3 = vld [vmem:[%s342_s9] sm:$0xff]  ;;  %689 = vperm.xlu0 %1033, %v663_v14   ;;  %694 = vperm.xlu1 %1034, %v664_v15   ;;  %s351_s30 = scalar_lea.vmem %s1262_s7, %s948_s24 }
  0x12   : > { %v372_v5 = vcombine.high %v354_v3, %v354_v3  ;;  %v353_v6 = vld [vmem:[%s332_s14] sm:$0xff] }
  0x13   : > { %v517_v7 = vcombine.high %v353_v6, %v353_v6 }
  0x14   : > { %949 = vmatprep.subr.msk.mxu1 %vm398_vm0, %v372_v5 }
  0x15   : > { %959 = vmatprep.subr.msk.mxu0 %vm398_vm0, %v517_v7  ;;  %950 = vmatpush1.msk.msra.mxu1 %vm398_vm0, %v354_v3 }
  0x16   : > { %960 = vmatpush1.msk.msra.mxu0 %vm398_vm0, %v353_v6  ;;  %951 = vmatmul.mubr.msk.f32.vlgmr.msra.gmra.mrb[0].mxu1 %vm373_vm1, %v363_v8 }
  0x17   : > { %961 = vmatmul.mubr.msk.f32.vlgmr.msra.gmra.mrb[0].mxu0 %vm373_vm1, %v355_v9  ;;  %473 = vmatprep.mubr.f32.mxu1 %v1061_v0 }
  0x18   : > { %616 = vmatprep.mubr.f32.mxu0 %v1061_v0  ;;  %699 = vperm.xlu0 %1033, %v665_v18  }
  0x19   : > { %704 = vperm.xlu1 %1034, %v666_v19  }
  0x1a   : > { %952 = vmatmul.mubr.msk.f32.gmra.mrb[2].mxu1 %vm373_vm1, %v364_v12 }
  0x1b   : > { %962 = vmatmul.mubr.msk.f32.gmra.mrb[2].mxu0 %vm373_vm1, %v356_v13  ;;  %479 = vmatprep.mubr.f32.mxu1 %v1061_v0 }
  0x1c   : > { %622 = vmatprep.mubr.f32.mxu0 %v1061_v0 }
  0x1e   : > { %953 = vmatmul.mubr.msk.f32.gmra.mrb[4].mxu1 %vm373_vm1, %v365_v16 }
  0x1f   : > { %963 = vmatmul.mubr.msk.f32.gmra.mrb[4].mxu0 %vm373_vm1, %v357_v17  ;;  %485 = vmatprep.mubr.f32.mxu1 %v1061_v0 }
  0x20   : > { %628 = vmatprep.mubr.f32.mxu0 %v1061_v0 }
  0x22   : > { %954 = vmatmul.mubr.msk.f32.gmra.mrb[6].mxu1 %vm373_vm1, %v366_v20 }
  0x23   : > { %964 = vmatmul.mubr.msk.f32.gmra.mrb[6].mxu0 %vm373_vm1, %v358_v21  ;;  %491 = vmatprep.mubr.f32.mxu1 %v1061_v0 }
  0x24   : > { %634 = vmatprep.mubr.f32.mxu0 %v1061_v0 }
  0x26   : > { %955 = vmatmul.mubr.msk.f32.gmra.mrb[8].mxu1 %vm373_vm1, %v367_v22 }
  0x27   : > { %965 = vmatmul.mubr.msk.f32.gmra.mrb[8].mxu0 %vm373_vm1, %v359_v23  ;;  %497 = vmatprep.mubr.f32.mxu1 %v1061_v0 }
  0x28   : > { %640 = vmatprep.mubr.f32.mxu0 %v1061_v0 }
  0x2a   : > { %956 = vmatmul.mubr.msk.f32.gmra.mrb[10].mxu1 %vm373_vm1, %v368_v24 }
  0x2b   : > { %966 = vmatmul.mubr.msk.f32.gmra.mrb[10].mxu0 %vm373_vm1, %v360_v25  ;;  %503 = vmatprep.mubr.f32.mxu1 %v1061_v0 }
  0x2c   : > { %646 = vmatprep.mubr.f32.mxu0 %v1061_v0 }
  0x2e   : > { %957 = vmatmul.mubr.msk.f32.gmra.mrb[12].mxu1 %vm373_vm1, %v369_v26 }
  0x2f   : > { %967 = vmatmul.mubr.msk.f32.gmra.mrb[12].mxu0 %vm373_vm1, %v361_v27  ;;  %509 = vmatprep.mubr.f32.mxu1 %v1061_v0 }
  0x30   : > { %652 = vmatprep.mubr.f32.mxu0 %v1061_v0 }
  0x32   : > { %958 = vmatmul.mubr.msk.f32.gmra.mrb[14].mxu1 %vm373_vm1, %v370_v28 }
  0x33   : > { %968 = vmatmul.mubr.msk.f32.gmra.mrb[14].mxu0 %vm373_vm1, %v362_v29  ;;  %810 = vmatprep.mubr.f32.mxu1 %v1061_v0 }
  0x88   : > { %v670_v30 = vpop.permute.xlu0 %669  ;;  %v680_v46 = vpop.permute.xlu1 %679 }
  0x8c   : > { %v675_v37 = vpop.permute.xlu0 %674  ;;  %v685_v3 = vpop.permute.xlu1 %684 }
  0x90   : > { %v690_v18 = vpop.permute.xlu0 %689  ;;  %v695_v27 = vpop.permute.xlu1 %694 }
  0xe9   : > { %v469_v31 = vpop.f32.mrb[0].mxu1 }
  0xea   : > { %v612_v32 = vpop.f32.mrb[0].mxu0  ;;  %v471_v33 = vpop.f32.mrb[1].mxu1 }
  0xeb   : > { %v613_v34 = vadd.f32 %v612_v32, %v469_v31  ;;  %v614_v35 = vpop.f32.mrb[1].mxu0 }
  0xec   : > { %v615_v36 = vadd.f32 %v614_v35, %v471_v33 }
  0xed   : > { %v475_v38 = vpop.f32.mrb[2].mxu1  ;;  %v707_v41 = vadd.f32 %v670_v30, %v613_v34 }
  0xee   : > { %v618_v39 = vpop.f32.mrb[2].mxu0  ;;  %v477_v40 = vpop.f32.mrb[3].mxu1  ;;  %v708_v44 = vadd.f32 %v670_v30, %v615_v36 }
  0xef   : > { %v619_v42 = vadd.f32 %v618_v39, %v475_v38  ;;  %v620_v43 = vpop.f32.mrb[3].mxu0  ;;  %v723_v52 = vmax.f32 %v707_v41, 0.0 }
  0xf0   : > { %v621_v45 = vadd.f32 %v620_v43, %v477_v40  ;;  %v724_v56 = vmax.f32 %v708_v44, 0.0 }
  0xf1   : > { %v709_v47 = vadd.f32 %v675_v37, %v619_v42  ;;  %v481_v48 = vpop.f32.mrb[4].mxu1  ;;  %v700_v42 = vpop.permute.xlu0 %699 }
  0xf2   : > { %v710_v49 = vadd.f32 %v675_v37, %v621_v45  ;;  %v624_v50 = vpop.f32.mrb[4].mxu0  ;;  %v483_v51 = vpop.f32.mrb[5].mxu1 }
  0xf3   : > { %v725_v53 = vmax.f32 %v709_v47, 0.0  ;;  %v625_v54 = vadd.f32 %v624_v50, %v481_v48  ;;  %v626_v55 = vpop.f32.mrb[5].mxu0 }
  0xf4   : > { %v726_v57 = vmax.f32 %v710_v49, 0.0  ;;  %v627_v58 = vadd.f32 %v626_v55, %v483_v51  ;;  %v705_v51 = vpop.permute.xlu1 %704 }
  0xf5   : > { %v976_v59 = vpack.c.bf16 %v725_v53, %v723_v52  ;;  %v487_v60 = vpop.f32.mrb[6].mxu1  ;;  %v711_v0 = vadd.f32 %v680_v46, %v625_v54 }
  0xf6   : > { %v630_v61 = vpop.f32.mrb[6].mxu0  ;;  %v489_v62 = vpop.f32.mrb[7].mxu1  ;;  %v974_v63 = vpack.c.bf16 %v726_v57, %v724_v56  ;;  %v712_v4 = vadd.f32 %v680_v46, %v627_v58 }
  0xf7   : > { %v631_v1 = vadd.f32 %v630_v61, %v487_v60  ;;  %v632_v2 = vpop.f32.mrb[7].mxu0  ;;  %v727_v11 = vmax.f32 %v711_v0, 0.0 }
  0xf8   : > { %v633_v5 = vadd.f32 %v632_v2, %v489_v62  ;;  %975 = vmatprep.subr.bf16.mxu1 %v974_v63  ;;  %v728_v15 = vmax.f32 %v712_v4, 0.0  ;;  %v739_v62 = vld [vmem:[%s1260_s5] sm:$0x1]  ;;  %v1063_v63 = vmov 1966171168   ;;  %v741_v2 = vstv %s740_s23 }
  0xf9   : > { %v713_v6 = vadd.f32 %v685_v3, %v631_v1  ;;  %977 = vmatpush1.bf16.msra.mxu1 %v976_v59  ;;  %v493_v7 = vpop.f32.mrb[8].mxu1  ;;  %v821_v0 = vunpack.c.l.s4 %v1063_v63  ;;  %v823_v1 = vlaneseq }
  0xfa   : > { %v714_v8 = vadd.f32 %v685_v3, %v633_v5  ;;  %v636_v9 = vpop.f32.mrb[8].mxu0  ;;  %v495_v10 = vpop.f32.mrb[9].mxu1 }
  0xfb   : > { %v729_v12 = vmax.f32 %v713_v6, 0.0  ;;  %v637_v13 = vadd.f32 %v636_v9, %v493_v7  ;;  %v638_v14 = vpop.f32.mrb[9].mxu0  ;;  %v822_v3 = vunpack.c.0.s8 %v821_v0  ;;  %v824_v4 = vshrl.u32 %v823_v1, 7 }
  0xfc   : > { %v730_v16 = vmax.f32 %v714_v8, 0.0  ;;  %v639_v17 = vadd.f32 %v638_v14, %v495_v10  ;;  %vm837_vm3 = vcmp.lt.s32.totalorder %v823_v1, 256 }
  0xfd   : > { %v980_v19 = vpack.c.bf16 %v729_v12, %v727_v11  ;;  %v499_v20 = vpop.f32.mrb[10].mxu1  ;;  %v715_v24 = vadd.f32 %v690_v18, %v637_v13  ;;  %v825_v9 = vsub.s32 %v822_v3, %v824_v4 }
  0xfe   : > { %v642_v21 = vpop.f32.mrb[10].mxu0  ;;  %v501_v22 = vpop.f32.mrb[11].mxu1  ;;  %v978_v23 = vpack.c.bf16 %v730_v16, %v728_v15  ;;  %v716_v28 = vadd.f32 %v690_v18, %v639_v17 }
  0xff   : > { %v643_v25 = vadd.f32 %v642_v21, %v499_v20  ;;  %v644_v26 = vpop.f32.mrb[11].mxu0  ;;  %v731_v35 = vmax.f32 %v715_v24, 0.0 }
 0x100   : > { %v645_v29 = vadd.f32 %v644_v26, %v501_v22  ;;  %979 = vmatprep.subr.bf16.mxu1 %v978_v23  ;;  %v732_v39 = vmax.f32 %v716_v28, 0.0 }
 0x101   : > { %v717_v30 = vadd.f32 %v695_v27, %v643_v25  ;;  %981 = vmatpush1.bf16.msra.mxu1 %v980_v19  ;;  %v505_v31 = vpop.f32.mrb[12].mxu1 }
 0x102   : > { %v718_v32 = vadd.f32 %v695_v27, %v645_v29  ;;  %v648_v33 = vpop.f32.mrb[12].mxu0  ;;  %v507_v34 = vpop.f32.mrb[13].mxu1 }
 0x103   : > { %v733_v36 = vmax.f32 %v717_v30, 0.0  ;;  %v649_v37 = vadd.f32 %v648_v33, %v505_v31  ;;  %v650_v38 = vpop.f32.mrb[13].mxu0 }
 0x104   : > { %v734_v40 = vmax.f32 %v718_v32, 0.0  ;;  %v651_v41 = vadd.f32 %v650_v38, %v507_v34 }
 0x105   : > { %v984_v43 = vpack.c.bf16 %v733_v36, %v731_v35  ;;  %v511_v44 = vpop.f32.mrb[14].mxu1  ;;  %v719_v48 = vadd.f32 %v700_v42, %v649_v37 }
 0x106   : > { %v654_v45 = vpop.f32.mrb[14].mxu0  ;;  %v513_v46 = vpop.f32.mrb[15].mxu1  ;;  %v982_v47 = vpack.c.bf16 %v734_v40, %v732_v39  ;;  %v720_v52 = vadd.f32 %v700_v42, %v651_v41 }
 0x107   : > { %v655_v49 = vadd.f32 %v654_v45, %v511_v44  ;;  %v656_v50 = vpop.f32.mrb[15].mxu0  ;;  %v735_v56 = vmax.f32 %v719_v48, 0.0 }
 0x108   : > { %v657_v53 = vadd.f32 %v656_v50, %v513_v46  ;;  %983 = vmatprep.subr.bf16.mxu1 %v982_v47  ;;  %v736_v58 = vmax.f32 %v720_v52, 0.0 }
 0x109   : > { %v721_v54 = vadd.f32 %v705_v51, %v655_v49  ;;  %985 = vmatpush1.bf16.msra.mxu1 %v984_v43 }
 0x10a   : > { %v722_v55 = vadd.f32 %v705_v51, %v657_v53 }
 0x10b   : > { %v737_v57 = vmax.f32 %v721_v54, 0.0 }
 0x10c   : > { %v738_v59 = vmax.f32 %v722_v55, 0.0 }
 0x10d   : > { %v988_v60 = vpack.c.bf16 %v737_v57, %v735_v56 }
 0x10e   : > { %v986_v61 = vpack.c.bf16 %v738_v59, %v736_v58 }
 0x110   : > { %987 = vmatprep.subr.bf16.mxu1 %v986_v61 }
 0x111   : > { %989 = vmatpush1.bf16.msra.mxu1 %v988_v60 }
 0x114   : > { %969 = vmatmul.mubr.msk.f32.vlgmr.msra.gmra.mrb[16].mxu1 %vm742_vm2, %v739_v62 }
 0x1e7   : > { %v812_v5 = vpop.f32.mrb[16].mxu1 }
 0x1e8   : > { %v813_v6 = vadd.f32 %v812_v5, %v741_v2  ;;  %v814_v7 = vpop.f32.mrb[17].mxu1 }
 0x1e9   : > { %v815_v8 = vadd.f32 %v814_v7, %v741_v2 }
 0x1eb   : > { %v819_v10 = vcombine.low %v813_v6, %v815_v8 }
 0x1ed   : > { %v826_v11 = vrot.slane %v819_v10, %v825_v9 }
 0x1ef   : > { %v833_v12 = vrot.slane %v826_v11, %v825_v9 }
 0x1f1   : > { %839 = vst.msk [vmem:[%s351_s30] sm:$0x3] %vm837_vm3, %v833_v12 }
 0x1f2 PF: > { %s18_s28 = sadd.s32 1, %s1059_s28   ;;  %s1263_s26 = smov %s1055_s27 }
 0x1f3   : > { %p15_p5 = scmp.ge.s32.totalorder %s18_s28, 4   ;;  %s1264_s27 = smov %s1266_s6 }
 0x1f5   :  { %17 = sbr.rel (!%p15_p5) target bundleno = 2 (0x2), region = 81 }

</bundles_post_ra>
